<compile_context>
chip_gen: v6e
topology: v6e:2x2x1
jax: 0.10.0
libtpu: 0.0.40
codegen_flags: <defaults>
</compile_context>

<pallas_src>
import jax
import jax.numpy as jnp
from jax import lax
from jax.experimental import pallas as pl
from jax.experimental.pallas import tpu as pltpu


def _make_gap_kernel(hw, inv_hw, staged):
    def _gap_kernel(x_ref, o_ref):
        if staged:
            # Sub-32-bit input: accumulate 128-lane columns into an f32
            # (r_blk, 128) partial; avoids materializing a full f32 block.
            n_chunks = hw // 128
            r_blk = x_ref.shape[0]

            def body(j, acc):
                off = pl.multiple_of(j * 128, 128)
                return acc + x_ref[:, pl.ds(off, 128)].astype(jnp.float32)

            acc = lax.fori_loop(0, n_chunks, body,
                                jnp.zeros((r_blk, 128), jnp.float32))
            s = jnp.sum(acc, axis=-1, keepdims=True)
        else:
            # f32 (or tiny hw): single cross-lane sum (XLU) per row.
            s = jnp.sum(x_ref[...].astype(jnp.float32), axis=-1, keepdims=True)
        o_ref[...] = (s * inv_hw).astype(o_ref.dtype)

    return _gap_kernel


def global_avg_pool2d(x, *, target_block_bytes=8 * 1024 * 1024):
    """Equivalent of F.avg_pool2d(x, (H, W)).view(N, C) for x of shape (N, C, H, W)."""
    n, c, h, w = x.shape
    rows = n * c
    hw = h * w
    x_flat = x.reshape(rows, hw)                      # free reshape (contiguous)

    itemsize = x.dtype.itemsize
    sub = max(8, 32 // itemsize)                      # sublane tile: 8 f32 / 16 bf16 / 32 i8
    lanes = pl.cdiv(hw, 128) * 128                    # lane-padded row footprint in VMEM
    bytes_per_row = lanes * itemsize

    # Row block sized for ~target_block_bytes of real VMEM, sublane-aligned.
    r_blk = max(sub, (target_block_bytes // bytes_per_row // sub) * sub)
    # Guarantee >= 2 grid steps when there is enough work (v7x megacore sharding).
    if rows > 2 * sub:
        half = pl.cdiv(pl.cdiv(rows, 2), sub) * sub
        r_blk = min(r_blk, half)
    if r_blk >= rows:
        r_blk = rows                                  # single full-extent block (always legal)
    grid = (pl.cdiv(rows, r_blk),)                    # ragged last block handled by Pallas

    inv_hw = 1.0 / float(hw)
    staged = (itemsize < 4) and (hw % 128 == 0) and (hw // 128 >= 2)

    block_bytes = r_blk * lanes * itemsize
    vmem_limit = int(max(32 * 1024 * 1024,
                         min(48 * 1024 * 1024, 2 * block_bytes + 4 * 1024 * 1024)))

    out = pl.pallas_call(
        _make_gap_kernel(hw, inv_hw, staged),
        out_shape=jax.ShapeDtypeStruct((rows, 1), x.dtype),
        grid_spec=pl.GridSpec(
            grid=grid,
            in_specs=[pl.BlockSpec((r_blk, hw), lambda i: (i, 0))],
            out_specs=pl.BlockSpec((r_blk, 1), lambda i: (i, 0)),
        ),
        compiler_params=pltpu.CompilerParams(
            dimension_semantics=("parallel",),
            vmem_limit_bytes=vmem_limit),
        cost_estimate=pl.CostEstimate(
            flops=rows * hw,
            transcendentals=0,
            bytes_accessed=rows * hw * itemsize + rows * itemsize),
    )(x_flat)

    return out[:, 0].reshape(n, c)


def _reference(x):
    # Pure-JAX reference mirroring the PyTorch module.
    return jnp.mean(x.astype(jnp.float32), axis=(2, 3)).astype(x.dtype)


if __name__ == "__main__":
    key = jax.random.PRNGKey(0)
    x = jax.random.normal(key, (2, 4, 16, 16), dtype=jnp.float32)

    out = global_avg_pool2d(x)
    out = jax.block_until_ready(out)

    ref = _reference(x)
    assert out.shape == (2, 4) and out.dtype == x.dtype
    assert jnp.allclose(out, ref, atol=1e-6, rtol=1e-6), "mismatch vs reference"

    print("KERNEL_OK")
</pallas_src>

<mosaic_0001>
module attributes {stable_mosaic.version = 11 : i64} {
  func.func @_gap_kernel(%arg0: i32, %arg1: memref<8x256xf32, #tpu.memory_space<vmem>>, %arg2: memref<8x1xf32, #tpu.memory_space<vmem>>) attributes {dimension_semantics = [#tpu.dimension_semantics<parallel>], iteration_bounds = array<i64: 1>, scalar_prefetch = 0 : i64, scratch_operands = 0 : i64, tpu.core_type = #tpu.core_type<tc>, window_params = [{transform_indices = @transform_0, window_bounds = array<i64: 8, 256>}, {transform_indices = @transform_1, window_bounds = array<i64: 8, 1>}]} {
    %c0 = arith.constant 0 : index
    %c0_0 = arith.constant 0 : index
    %0 = vector.load %arg1[%c0, %c0_0] : memref<8x256xf32, #tpu.memory_space<vmem>>, vector<8x256xf32>
    %cst = arith.constant dense<0.000000e+00> : vector<8xf32>
    %1 = vector.multi_reduction <add>, %0, %cst [1] : vector<8x256xf32> to vector<8xf32>
    %2 = vector.shape_cast %1 : vector<8xf32> to vector<8x1xf32>
    %cst_1 = arith.constant 3.906250e-03 : f32
    %3 = vector.broadcast %cst_1 : f32 to vector<8x1xf32>
    %4 = arith.mulf %2, %3 : vector<8x1xf32>
    %c0_2 = arith.constant 0 : index
    %c0_3 = arith.constant 0 : index
    %5 = vector.load %arg2[%c0_2, %c0_3] : memref<8x1xf32, #tpu.memory_space<vmem>>, vector<8x1xf32>
    tpu.vector_store %arg2[%c0_2, %c0_3], %4 {strides = array<i32>} : memref<8x1xf32, #tpu.memory_space<vmem>>, vector<8x1xf32>,
    return
  }
  func.func @transform_0(%arg0: i32) -> (i32, i32) {
    %c0_i32 = arith.constant 0 : i32
    %c0_i32_0 = arith.constant 0 : i32
    return %arg0, %c0_i32 : i32, i32
  }
  func.func @transform_1(%arg0: i32) -> (i32, i32) {
    %c0_i32 = arith.constant 0 : i32
    %c0_i32_0 = arith.constant 0 : i32
    return %arg0, %c0_i32 : i32, i32
  }
}

</mosaic_0001>

<bundles_post_ra>
// kernel: tpu_custom_call.1
= control target key start
LH: loop header
LB: loop body
LE: loop exit
PB: predicated region body
PF: predicated region fallthrough
CT: control target
= control target key end

     0   :  { %6 = vsyncpa [#allocation3], 0  ;;  %s56_s6 = smov [#allocation2]   ;;  %s73_s0 = inlined_call_operand.hbm [shape: f32[8,256], index: 0, kind: input, shape index: {}]   ;;  %s74_s1 = inlined_call_operand.vmem [shape: f32[8,1], index: 1, kind: output, shape index: {}]  }
   0x1   :  { %s13_s7 = sshll.u32 %s56_s6, 4  ;;  %s14_s7 = int_to_ptr.vmem [resolvable:$true] %s13_s7 }
   0x2   :  { %s42_s8 = scalar_lea.vmem %s14_s7, 256  ;;  %p47_p1 = scmp.lt.s32.totalorder %s14_s7, %s14_s7 }
   0x3   :  { %p43_p0 = scmp.ne.s32.totalorder %s14_s7, %s42_s8  ;;  %p48_p2 = scmp.lt.s32.totalorder %s42_s8, %s42_s8 }
   0x5   :  { %p49_p3 = por %p48_p2, %p47_p1 }
   0x7   :  { %p50_p4 = pnand %p49_p3, %p43_p0 }
   0x9   :  { %53 = shalt.err (!%p50_p4)
}
   0xa   :  { %16 = dma.hbm_to_vmem [thread:$0]  %s73_s0, 256, %s14_s7, [#allocation3]  }
   0xb   :  { %54 = dma.done.wait [#allocation3], 256  }
   0xc   :  { %55 = vsyncadd [#allocation3], 4294967040  ;;  %v20_v0 = vld [vmem:[#allocation2] sm:$0xff]  ;;  %v21_v1 = vld [vmem:[#allocation2 + $0x8] sm:$0xff]  ;;  %vm26_vm0 = vcmask 7168  }
   0xd   :  { %v22_v2 = vadd.f32 %v21_v1, %v20_v0 }
   0xf   :  { %23 = vadd.xlane.f32.xlu0 %v22_v2 }
  0x98   :  { %v24_v3 = vpop.xlane.xlu0 %23 }
  0x99   :  { %v25_v4 = vmul.f32 0.00390625, %v24_v3 }
  0x9b   :  { %27 = vst.msk [vmem:[%s74_s1] sm:$0xff] %vm26_vm0, %v25_v4 }
  0x9c   :  { %32 = vsyncpa [#allocation3], 1 }

</bundles_post_ra>
